<compile_context>
chip_gen: v6e
topology: v6e:2x2x1
jax: 0.10.0
libtpu: 0.0.40
codegen_flags: <defaults>
</compile_context>

<pallas_src>
import functools
import math

import jax
import jax.numpy as jnp
from jax.experimental import pallas as pl
from jax.experimental.pallas import tpu as pltpu

# ----- module hyper-parameters (defaults from __init__) ----------------------
GAMMA_POS = 0
GAMMA_NEG = 4
CLIP = 0.2
K = 2


def _rcp(x):
    """~f32-accurate reciprocal: EUP approx vrcp + one Newton-Raphson step
    (the NR mul/adds ride in otherwise-idle VALU slots)."""
    r = pl.reciprocal(x, approx=True)
    return r * (2.0 - x * r)


def _digamma_parts(x, shift_steps):
    """digamma(x) = log(z) + tail, returned as (z, 1/z, tail).

    The recurrence psi(x) = psi(x+s) - sum_{i<s} 1/(x+i) pushes the argument
    to z = x + s; the truncated Stirling series is below f32 eps for z >= 4,
    so s = 4 suffices for any x > 0 (s = 0 when the caller guarantees x >= 4).
    """
    if shift_steps == 0:
        shift = 0.0
        z = x
    elif shift_steps == 4:
        # sum_{i=0..3} 1/(x+i) = (((4x+18)x+22)x+6) / (x(x+1)(x+2)(x+3))
        num = ((4.0 * x + 18.0) * x + 22.0) * x + 6.0
        den = (x * (x + 1.0)) * ((x + 2.0) * (x + 3.0))
        shift = num * _rcp(den)
        z = x + 4.0
    else:
        # pairwise-combined fallback for other (small) shift counts
        shift = jnp.zeros_like(x)
        j = 0
        while j + 1 < shift_steps:
            num = 2.0 * x + float(2 * j + 1)
            den = (x + float(j)) * (x + float(j + 1))
            shift = shift + num * _rcp(den)
            j += 2
        if j < shift_steps:
            shift = shift + _rcp(x + float(j))
        z = x + float(shift_steps)

    inv = _rcp(z)
    inv2 = inv * inv
    tail = (
        -0.5 * inv
        - inv2 * (1.0 / 12.0
                  - inv2 * (1.0 / 120.0
                            - inv2 * (1.0 / 252.0 - inv2 * (1.0 / 240.0))))
        - shift
    )
    return z, inv, tail


def _digamma_diff(x_plus, x_minus, shift_plus, shift_minus):
    """digamma(x_plus) - digamma(x_minus) with the two logs fused into one."""
    z_p, _, tail_p = _digamma_parts(x_plus, shift_plus)
    _, inv_m, tail_m = _digamma_parts(x_minus, shift_minus)
    return jnp.log(z_p * inv_m) + (tail_p - tail_m)


def _asym_beta_loss_kernel(a_ref, b_ref, y_ref, o_ref):
    a = a_ref[...].astype(jnp.float32)   # B_alpha tile
    b = b_ref[...].astype(jnp.float32)   # B_beta  tile
    y = y_ref[...].astype(jnp.float32)   # label   tile

    # label powers first (y dies here; keeps live ranges short)
    one_m_y = 1.0 - y
    y_k = y
    one_m_y_k = one_m_y
    for _ in range(K - 1):
        y_k = y_k * y
        one_m_y_k = one_m_y_k * one_m_y

    # ---- positive branch: finish pos_term before starting the a_m chain ----
    lp_arg = a + b + float(GAMMA_POS) if GAMMA_POS else a + b
    lp = _digamma_diff(lp_arg, a,
                       shift_plus=max(0, 4 - GAMMA_POS), shift_minus=4)
    if GAMMA_POS > 0:
        wp_num = jnp.ones_like(a)
        wp_den = jnp.ones_like(a)
        for i in range(GAMMA_POS):
            wp_num = wp_num * (b + float(i))
            wp_den = wp_den * (a + b + float(i))
        pos_term = (wp_num * _rcp(wp_den)) * y_k * lp
    else:
        pos_term = y_k * lp

    # ---- negative branch ----------------------------------------------------
    ratio = float(CLIP / (1.0 - CLIP))
    a_m = jnp.maximum(a - ratio * b, 0.0)
    # argument a_m + b + GAMMA_NEG is >= GAMMA_NEG, so shift only what's needed
    ln = _digamma_diff(a_m + b + float(GAMMA_NEG), b,
                       shift_plus=max(0, 4 - GAMMA_NEG), shift_minus=4)
    if GAMMA_NEG > 0:
        wn_num = jnp.ones_like(a)
        wn_den = jnp.ones_like(a)
        for i in range(GAMMA_NEG):
            wn_num = wn_num * (a_m + float(i))
            wn_den = wn_den * (a_m + b + float(i))
        neg_term = (wn_num * _rcp(wn_den)) * one_m_y_k * ln
    else:
        neg_term = one_m_y_k * ln

    o_ref[...] = (pos_term + neg_term).astype(o_ref.dtype)


def _num_tensorcores():
    """Best-effort TensorCore count (2 on v7x megacore, else 1).  Falls back
    to 2 so the grid stays megacore-friendly if detection is unavailable."""
    try:
        info = pltpu.get_tpu_info()
        for attr in ("num_cores", "core_count", "num_tensorcores",
                     "tensorcore_count"):
            v = getattr(info, attr, None)
            if isinstance(v, int) and v > 0:
                return v
    except Exception:
        pass
    return 2


def _plan_tiles(n, c, *, target_rows=1024, vmem_budget_bytes=12 << 20,
                num_cores=None):
    """Choose (tile_n, n_padded):
      * tile_n is a multiple of 8 and the (tile_n, C) f32 working set
        (3 inputs + 1 output, double-buffered) fits the VMEM budget
        (portable down to v7x's 64 MiB VMEM / 32 MiB scoped default),
      * grid length is a multiple of the TensorCore count when N is big
        enough (even split across v7x's two cores),
      * N is padded up to grid * tile_n (no whole-array fallback)."""
    if num_cores is None:
        num_cores = _num_tensorcores()
    bytes_per_row = 4 * 2 * c * 4            # 4 arrays x 2 buffers x c x f32
    max_rows = max(8, (vmem_budget_bytes // bytes_per_row) // 8 * 8)
    cap = min(target_rows, max_rows)
    steps = max(1, math.ceil(n / cap))
    if num_cores > 1 and n > 8:
        steps = math.ceil(steps / num_cores) * num_cores
    tile = min(cap, math.ceil(math.ceil(n / steps) / 8) * 8)
    return tile, steps * tile


@functools.partial(jax.jit, static_argnames=("tile_n",))
def _asym_beta_loss_call(b_alpha, b_beta, y, *, tile_n):
    n, c = b_alpha.shape
    grid = (n // tile_n,)
    spec = pl.BlockSpec((tile_n, c), lambda i: (i, 0))
    return pl.pallas_call(
        _asym_beta_loss_kernel,
        out_shape=jax.ShapeDtypeStruct((n, c), jnp.float32),
        grid_spec=pltpu.PrefetchScalarGridSpec(
            num_scalar_prefetch=0,
            grid=grid,
            in_specs=[spec, spec, spec],
            out_specs=spec,
        ),
        compiler_params=pltpu.CompilerParams(
            dimension_semantics=("parallel",)),
    )(b_alpha, b_beta, y)


def asymmetric_beta_loss(b_alpha, b_beta, y):
    """Elementwise asymmetric Beta loss. Inputs: [N, C], C % 128 == 0,
    B_alpha > 0 and B_beta > 0 (Beta-distribution evidence).  f32 (or bf16)
    inputs are upcast to f32 inside the kernel; output is f32."""
    n, c = b_alpha.shape
    assert c % 128 == 0, "C must be a multiple of 128 (lane-dense layout)"
    tile_n, n_pad = _plan_tiles(n, c)
    if n_pad != n:
        pad = ((0, n_pad - n), (0, 0))
        b_alpha = jnp.pad(b_alpha, pad, constant_values=1.0)
        b_beta = jnp.pad(b_beta, pad, constant_values=1.0)
        y = jnp.pad(y, pad, constant_values=0.0)
    out = _asym_beta_loss_call(b_alpha, b_beta, y, tile_n=tile_n)
    return out[:n] if n_pad != n else out


def _reference(b_alpha, b_beta, y):
    """Pure-JAX reference (float32) mirroring the PyTorch forward."""
    dg = jax.scipy.special.digamma
    lp = dg(b_alpha + b_beta + GAMMA_POS) - dg(b_alpha)
    m = jnp.float32(CLIP)
    a_m = jnp.maximum(b_alpha - m / (1 - m) * b_beta, 0.0)
    ln = dg(a_m + b_beta + GAMMA_NEG) - dg(b_beta)
    w_pos = jnp.ones_like(b_alpha)
    w_neg = jnp.ones_like(b_beta)
    for i in range(GAMMA_POS):
        w_pos = w_pos * (b_beta + i) / (b_alpha + b_beta + i)
    for i in range(GAMMA_NEG):
        w_neg = w_neg * (a_m + i) / (a_m + b_beta + i)
    return w_pos * y**K * lp + w_neg * (1 - y)**K * ln


if __name__ == "__main__":
    key = jax.random.PRNGKey(0)
    k1, k2, k3 = jax.random.split(key, 3)

    N, C = 16, 128  # small [batch, num_classes]
    # Beta evidence parameters are strictly positive (typically >= 1).
    b_alpha = 1.0 + jnp.exp(jax.random.normal(k1, (N, C), jnp.float32))
    b_beta = 1.0 + jnp.exp(jax.random.normal(k2, (N, C), jnp.float32))
    # multi-hot labels in {0, 1}
    y = (jax.random.uniform(k3, (N, C)) > 0.5).astype(jnp.float32)

    out = asymmetric_beta_loss(b_alpha, b_beta, y)
    out = jax.block_until_ready(out)

    ref = _reference(b_alpha, b_beta, y)
    assert out.shape == (N, C) and out.dtype == jnp.float32
    assert jnp.max(jnp.abs(out - ref)) < 1e-4, "mismatch vs reference"

    print("KERNEL_OK")
</pallas_src>

<mosaic_0001>
module attributes {stable_mosaic.version = 11 : i64} {
  func.func @_asym_beta_loss_kernel(%arg0: i32, %arg1: memref<8x128xf32, #tpu.memory_space<vmem>>, %arg2: memref<8x128xf32, #tpu.memory_space<vmem>>, %arg3: memref<8x128xf32, #tpu.memory_space<vmem>>, %arg4: memref<8x128xf32, #tpu.memory_space<vmem>>) attributes {dimension_semantics = [#tpu.dimension_semantics<parallel>], iteration_bounds = array<i64: 2>, scalar_prefetch = 0 : i64, scratch_operands = 0 : i64, tpu.core_type = #tpu.core_type<tc>, window_params = [{transform_indices = @transform_0, window_bounds = array<i64: 8, 128>}, {transform_indices = @transform_1, window_bounds = array<i64: 8, 128>}, {transform_indices = @transform_2, window_bounds = array<i64: 8, 128>}, {transform_indices = @transform_3, window_bounds = array<i64: 8, 128>}]} {
    %c0 = arith.constant 0 : index
    %c0_0 = arith.constant 0 : index
    %0 = vector.load %arg1[%c0, %c0_0] : memref<8x128xf32, #tpu.memory_space<vmem>>, vector<8x128xf32>
    %c0_1 = arith.constant 0 : index
    %c0_2 = arith.constant 0 : index
    %1 = vector.load %arg2[%c0_1, %c0_2] : memref<8x128xf32, #tpu.memory_space<vmem>>, vector<8x128xf32>
    %c0_3 = arith.constant 0 : index
    %c0_4 = arith.constant 0 : index
    %2 = vector.load %arg3[%c0_3, %c0_4] : memref<8x128xf32, #tpu.memory_space<vmem>>, vector<8x128xf32>
    %cst = arith.constant 1.000000e+00 : f32
    %3 = vector.broadcast %cst : f32 to vector<8x128xf32>
    %4 = arith.subf %3, %2 : vector<8x128xf32>
    %5 = arith.mulf %2, %2 : vector<8x128xf32>
    %6 = arith.mulf %4, %4 : vector<8x128xf32>
    %7 = arith.addf %0, %1 : vector<8x128xf32>
    %cst_5 = arith.constant 4.000000e+00 : f32
    %8 = vector.broadcast %cst_5 : f32 to vector<8x128xf32>
    %9 = arith.mulf %8, %7 : vector<8x128xf32>
    %cst_6 = arith.constant 1.800000e+01 : f32
    %10 = vector.broadcast %cst_6 : f32 to vector<8x128xf32>
    %11 = arith.addf %9, %10 : vector<8x128xf32>
    %12 = arith.mulf %11, %7 : vector<8x128xf32>
    %cst_7 = arith.constant 2.200000e+01 : f32
    %13 = vector.broadcast %cst_7 : f32 to vector<8x128xf32>
    %14 = arith.addf %12, %13 : vector<8x128xf32>
    %15 = arith.mulf %14, %7 : vector<8x128xf32>
    %cst_8 = arith.constant 6.000000e+00 : f32
    %16 = vector.broadcast %cst_8 : f32 to vector<8x128xf32>
    %17 = arith.addf %15, %16 : vector<8x128xf32>
    %cst_9 = arith.constant 1.000000e+00 : f32
    %18 = vector.broadcast %cst_9 : f32 to vector<8x128xf32>
    %19 = arith.addf %7, %18 : vector<8x128xf32>
    %20 = arith.mulf %7, %19 : vector<8x128xf32>
    %cst_10 = arith.constant 2.000000e+00 : f32
    %21 = vector.broadcast %cst_10 : f32 to vector<8x128xf32>
    %22 = arith.addf %7, %21 : vector<8x128xf32>
    %cst_11 = arith.constant 3.000000e+00 : f32
    %23 = vector.broadcast %cst_11 : f32 to vector<8x128xf32>
    %24 = arith.addf %7, %23 : vector<8x128xf32>
    %25 = arith.mulf %22, %24 : vector<8x128xf32>
    %26 = arith.mulf %20, %25 : vector<8x128xf32>
    %27 = tpu.reciprocal %26 {approx = true} : vector<8x128xf32> -> vector<8x128xf32>
    %28 = arith.mulf %26, %27 : vector<8x128xf32>
    %cst_12 = arith.constant 2.000000e+00 : f32
    %29 = vector.broadcast %cst_12 : f32 to vector<8x128xf32>
    %30 = arith.subf %29, %28 : vector<8x128xf32>
    %31 = arith.mulf %27, %30 : vector<8x128xf32>
    %32 = arith.mulf %17, %31 : vector<8x128xf32>
    %cst_13 = arith.constant 4.000000e+00 : f32
    %33 = vector.broadcast %cst_13 : f32 to vector<8x128xf32>
    %34 = arith.addf %7, %33 : vector<8x128xf32>
    %35 = tpu.reciprocal %34 {approx = true} : vector<8x128xf32> -> vector<8x128xf32>
    %36 = arith.mulf %34, %35 : vector<8x128xf32>
    %cst_14 = arith.constant 2.000000e+00 : f32
    %37 = vector.broadcast %cst_14 : f32 to vector<8x128xf32>
    %38 = arith.subf %37, %36 : vector<8x128xf32>
    %39 = arith.mulf %35, %38 : vector<8x128xf32>
    %40 = arith.mulf %39, %39 : vector<8x128xf32>
    %cst_15 = arith.constant -5.000000e-01 : f32
    %41 = vector.broadcast %cst_15 : f32 to vector<8x128xf32>
    %42 = arith.mulf %41, %39 : vector<8x128xf32>
    %cst_16 = arith.constant 0.00416666688 : f32
    %43 = vector.broadcast %cst_16 : f32 to vector<8x128xf32>
    %44 = arith.mulf %40, %43 : vector<8x128xf32>
    %cst_17 = arith.constant 0.0039682542 : f32
    %45 = vector.broadcast %cst_17 : f32 to vector<8x128xf32>
    %46 = arith.subf %45, %44 : vector<8x128xf32>
    %47 = arith.mulf %40, %46 : vector<8x128xf32>
    %cst_18 = arith.constant 0.00833333377 : f32
    %48 = vector.broadcast %cst_18 : f32 to vector<8x128xf32>
    %49 = arith.subf %48, %47 : vector<8x128xf32>
    %50 = arith.mulf %40, %49 : vector<8x128xf32>
    %cst_19 = arith.constant 0.0833333358 : f32
    %51 = vector.broadcast %cst_19 : f32 to vector<8x128xf32>
    %52 = arith.subf %51, %50 : vector<8x128xf32>
    %53 = arith.mulf %40, %52 : vector<8x128xf32>
    %54 = arith.subf %42, %53 : vector<8x128xf32>
    %55 = arith.subf %54, %32 : vector<8x128xf32>
    %cst_20 = arith.constant 4.000000e+00 : f32
    %56 = vector.broadcast %cst_20 : f32 to vector<8x128xf32>
    %57 = arith.mulf %56, %0 : vector<8x128xf32>
    %cst_21 = arith.constant 1.800000e+01 : f32
    %58 = vector.broadcast %cst_21 : f32 to vector<8x128xf32>
    %59 = arith.addf %57, %58 : vector<8x128xf32>
    %60 = arith.mulf %59, %0 : vector<8x128xf32>
    %cst_22 = arith.constant 2.200000e+01 : f32
    %61 = vector.broadcast %cst_22 : f32 to vector<8x128xf32>
    %62 = arith.addf %60, %61 : vector<8x128xf32>
    %63 = arith.mulf %62, %0 : vector<8x128xf32>
    %cst_23 = arith.constant 6.000000e+00 : f32
    %64 = vector.broadcast %cst_23 : f32 to vector<8x128xf32>
    %65 = arith.addf %63, %64 : vector<8x128xf32>
    %cst_24 = arith.constant 1.000000e+00 : f32
    %66 = vector.broadcast %cst_24 : f32 to vector<8x128xf32>
    %67 = arith.addf %0, %66 : vector<8x128xf32>
    %68 = arith.mulf %0, %67 : vector<8x128xf32>
    %cst_25 = arith.constant 2.000000e+00 : f32
    %69 = vector.broadcast %cst_25 : f32 to vector<8x128xf32>
    %70 = arith.addf %0, %69 : vector<8x128xf32>
    %cst_26 = arith.constant 3.000000e+00 : f32
    %71 = vector.broadcast %cst_26 : f32 to vector<8x128xf32>
    %72 = arith.addf %0, %71 : vector<8x128xf32>
    %73 = arith.mulf %70, %72 : vector<8x128xf32>
    %74 = arith.mulf %68, %73 : vector<8x128xf32>
    %75 = tpu.reciprocal %74 {approx = true} : vector<8x128xf32> -> vector<8x128xf32>
    %76 = arith.mulf %74, %75 : vector<8x128xf32>
    %cst_27 = arith.constant 2.000000e+00 : f32
    %77 = vector.broadcast %cst_27 : f32 to vector<8x128xf32>
    %78 = arith.subf %77, %76 : vector<8x128xf32>
    %79 = arith.mulf %75, %78 : vector<8x128xf32>
    %80 = arith.mulf %65, %79 : vector<8x128xf32>
    %cst_28 = arith.constant 4.000000e+00 : f32
    %81 = vector.broadcast %cst_28 : f32 to vector<8x128xf32>
    %82 = arith.addf %0, %81 : vector<8x128xf32>
    %83 = tpu.reciprocal %82 {approx = true} : vector<8x128xf32> -> vector<8x128xf32>
    %84 = arith.mulf %82, %83 : vector<8x128xf32>
    %cst_29 = arith.constant 2.000000e+00 : f32
    %85 = vector.broadcast %cst_29 : f32 to vector<8x128xf32>
    %86 = arith.subf %85, %84 : vector<8x128xf32>
    %87 = arith.mulf %83, %86 : vector<8x128xf32>
    %88 = arith.mulf %87, %87 : vector<8x128xf32>
    %cst_30 = arith.constant -5.000000e-01 : f32
    %89 = vector.broadcast %cst_30 : f32 to vector<8x128xf32>
    %90 = arith.mulf %89, %87 : vector<8x128xf32>
    %cst_31 = arith.constant 0.00416666688 : f32
    %91 = vector.broadcast %cst_31 : f32 to vector<8x128xf32>
    %92 = arith.mulf %88, %91 : vector<8x128xf32>
    %cst_32 = arith.constant 0.0039682542 : f32
    %93 = vector.broadcast %cst_32 : f32 to vector<8x128xf32>
    %94 = arith.subf %93, %92 : vector<8x128xf32>
    %95 = arith.mulf %88, %94 : vector<8x128xf32>
    %cst_33 = arith.constant 0.00833333377 : f32
    %96 = vector.broadcast %cst_33 : f32 to vector<8x128xf32>
    %97 = arith.subf %96, %95 : vector<8x128xf32>
    %98 = arith.mulf %88, %97 : vector<8x128xf32>
    %cst_34 = arith.constant 0.0833333358 : f32
    %99 = vector.broadcast %cst_34 : f32 to vector<8x128xf32>
    %100 = arith.subf %99, %98 : vector<8x128xf32>
    %101 = arith.mulf %88, %100 : vector<8x128xf32>
    %102 = arith.subf %90, %101 : vector<8x128xf32>
    %103 = arith.subf %102, %80 : vector<8x128xf32>
    %104 = arith.mulf %34, %87 : vector<8x128xf32>
    %105 = math.log %104 : vector<8x128xf32>
    %106 = arith.subf %55, %103 : vector<8x128xf32>
    %107 = arith.addf %105, %106 : vector<8x128xf32>
    %108 = arith.mulf %5, %107 : vector<8x128xf32>
    %cst_35 = arith.constant 2.500000e-01 : f32
    %109 = vector.broadcast %cst_35 : f32 to vector<8x128xf32>
    %110 = arith.mulf %109, %1 : vector<8x128xf32>
    %111 = arith.subf %0, %110 : vector<8x128xf32>
    %cst_36 = arith.constant 0.000000e+00 : f32
    %112 = vector.broadcast %cst_36 : f32 to vector<8x128xf32>
    %113 = arith.maximumf %111, %112 : vector<8x128xf32>
    %114 = arith.addf %113, %1 : vector<8x128xf32>
    %cst_37 = arith.constant 4.000000e+00 : f32
    %115 = vector.broadcast %cst_37 : f32 to vector<8x128xf32>
    %116 = arith.addf %114, %115 : vector<8x128xf32>
    %117 = tpu.reciprocal %116 {approx = true} : vector<8x128xf32> -> vector<8x128xf32>
    %118 = arith.mulf %116, %117 : vector<8x128xf32>
    %cst_38 = arith.constant 2.000000e+00 : f32
    %119 = vector.broadcast %cst_38 : f32 to vector<8x128xf32>
    %120 = arith.subf %119, %118 : vector<8x128xf32>
    %121 = arith.mulf %117, %120 : vector<8x128xf32>
    %122 = arith.mulf %121, %121 : vector<8x128xf32>
    %cst_39 = arith.constant -5.000000e-01 : f32
    %123 = vector.broadcast %cst_39 : f32 to vector<8x128xf32>
    %124 = arith.mulf %123, %121 : vector<8x128xf32>
    %cst_40 = arith.constant 0.00416666688 : f32
    %125 = vector.broadcast %cst_40 : f32 to vector<8x128xf32>
    %126 = arith.mulf %122, %125 : vector<8x128xf32>
    %cst_41 = arith.constant 0.0039682542 : f32
    %127 = vector.broadcast %cst_41 : f32 to vector<8x128xf32>
    %128 = arith.subf %127, %126 : vector<8x128xf32>
    %129 = arith.mulf %122, %128 : vector<8x128xf32>
    %cst_42 = arith.constant 0.00833333377 : f32
    %130 = vector.broadcast %cst_42 : f32 to vector<8x128xf32>
    %131 = arith.subf %130, %129 : vector<8x128xf32>
    %132 = arith.mulf %122, %131 : vector<8x128xf32>
    %cst_43 = arith.constant 0.0833333358 : f32
    %133 = vector.broadcast %cst_43 : f32 to vector<8x128xf32>
    %134 = arith.subf %133, %132 : vector<8x128xf32>
    %135 = arith.mulf %122, %134 : vector<8x128xf32>
    %136 = arith.subf %124, %135 : vector<8x128xf32>
    %cst_44 = arith.constant 0.000000e+00 : f32
    %137 = vector.broadcast %cst_44 : f32 to vector<8x128xf32>
    %138 = arith.subf %136, %137 : vector<8x128xf32>
    %cst_45 = arith.constant 4.000000e+00 : f32
    %139 = vector.broadcast %cst_45 : f32 to vector<8x128xf32>
    %140 = arith.mulf %139, %1 : vector<8x128xf32>
    %cst_46 = arith.constant 1.800000e+01 : f32
    %141 = vector.broadcast %cst_46 : f32 to vector<8x128xf32>
    %142 = arith.addf %140, %141 : vector<8x128xf32>
    %143 = arith.mulf %142, %1 : vector<8x128xf32>
    %cst_47 = arith.constant 2.200000e+01 : f32
    %144 = vector.broadcast %cst_47 : f32 to vector<8x128xf32>
    %145 = arith.addf %143, %144 : vector<8x128xf32>
    %146 = arith.mulf %145, %1 : vector<8x128xf32>
    %cst_48 = arith.constant 6.000000e+00 : f32
    %147 = vector.broadcast %cst_48 : f32 to vector<8x128xf32>
    %148 = arith.addf %146, %147 : vector<8x128xf32>
    %cst_49 = arith.constant 1.000000e+00 : f32
    %149 = vector.broadcast %cst_49 : f32 to vector<8x128xf32>
    %150 = arith.addf %1, %149 : vector<8x128xf32>
    %151 = arith.mulf %1, %150 : vector<8x128xf32>
    %cst_50 = arith.constant 2.000000e+00 : f32
    %152 = vector.broadcast %cst_50 : f32 to vector<8x128xf32>
    %153 = arith.addf %1, %152 : vector<8x128xf32>
    %cst_51 = arith.constant 3.000000e+00 : f32
    %154 = vector.broadcast %cst_51 : f32 to vector<8x128xf32>
    %155 = arith.addf %1, %154 : vector<8x128xf32>
    %156 = arith.mulf %153, %155 : vector<8x128xf32>
    %157 = arith.mulf %151, %156 : vector<8x128xf32>
    %158 = tpu.reciprocal %157 {approx = true} : vector<8x128xf32> -> vector<8x128xf32>
    %159 = arith.mulf %157, %158 : vector<8x128xf32>
    %cst_52 = arith.constant 2.000000e+00 : f32
    %160 = vector.broadcast %cst_52 : f32 to vector<8x128xf32>
    %161 = arith.subf %160, %159 : vector<8x128xf32>
    %162 = arith.mulf %158, %161 : vector<8x128xf32>
    %163 = arith.mulf %148, %162 : vector<8x128xf32>
    %cst_53 = arith.constant 4.000000e+00 : f32
    %164 = vector.broadcast %cst_53 : f32 to vector<8x128xf32>
    %165 = arith.addf %1, %164 : vector<8x128xf32>
    %166 = tpu.reciprocal %165 {approx = true} : vector<8x128xf32> -> vector<8x128xf32>
    %167 = arith.mulf %165, %166 : vector<8x128xf32>
    %cst_54 = arith.constant 2.000000e+00 : f32
    %168 = vector.broadcast %cst_54 : f32 to vector<8x128xf32>
    %169 = arith.subf %168, %167 : vector<8x128xf32>
    %170 = arith.mulf %166, %169 : vector<8x128xf32>
    %171 = arith.mulf %170, %170 : vector<8x128xf32>
    %cst_55 = arith.constant -5.000000e-01 : f32
    %172 = vector.broadcast %cst_55 : f32 to vector<8x128xf32>
    %173 = arith.mulf %172, %170 : vector<8x128xf32>
    %cst_56 = arith.constant 0.00416666688 : f32
    %174 = vector.broadcast %cst_56 : f32 to vector<8x128xf32>
    %175 = arith.mulf %171, %174 : vector<8x128xf32>
    %cst_57 = arith.constant 0.0039682542 : f32
    %176 = vector.broadcast %cst_57 : f32 to vector<8x128xf32>
    %177 = arith.subf %176, %175 : vector<8x128xf32>
    %178 = arith.mulf %171, %177 : vector<8x128xf32>
    %cst_58 = arith.constant 0.00833333377 : f32
    %179 = vector.broadcast %cst_58 : f32 to vector<8x128xf32>
    %180 = arith.subf %179, %178 : vector<8x128xf32>
    %181 = arith.mulf %171, %180 : vector<8x128xf32>
    %cst_59 = arith.constant 0.0833333358 : f32
    %182 = vector.broadcast %cst_59 : f32 to vector<8x128xf32>
    %183 = arith.subf %182, %181 : vector<8x128xf32>
    %184 = arith.mulf %171, %183 : vector<8x128xf32>
    %185 = arith.subf %173, %184 : vector<8x128xf32>
    %186 = arith.subf %185, %163 : vector<8x128xf32>
    %187 = arith.mulf %116, %170 : vector<8x128xf32>
    %188 = math.log %187 : vector<8x128xf32>
    %189 = arith.subf %138, %186 : vector<8x128xf32>
    %190 = arith.addf %188, %189 : vector<8x128xf32>
    %cst_60 = arith.constant 1.000000e+00 : f32
    %191 = vector.broadcast %cst_60 : f32 to vector<8x128xf32>
    %cst_61 = arith.constant 1.000000e+00 : f32
    %192 = vector.broadcast %cst_61 : f32 to vector<8x128xf32>
    %cst_62 = arith.constant 0.000000e+00 : f32
    %193 = vector.broadcast %cst_62 : f32 to vector<8x128xf32>
    %194 = arith.addf %113, %193 : vector<8x128xf32>
    %195 = arith.mulf %191, %194 : vector<8x128xf32>
    %196 = arith.addf %113, %1 : vector<8x128xf32>
    %cst_63 = arith.constant 0.000000e+00 : f32
    %197 = vector.broadcast %cst_63 : f32 to vector<8x128xf32>
    %198 = arith.addf %196, %197 : vector<8x128xf32>
    %199 = arith.mulf %192, %198 : vector<8x128xf32>
    %cst_64 = arith.constant 1.000000e+00 : f32
    %200 = vector.broadcast %cst_64 : f32 to vector<8x128xf32>
    %201 = arith.addf %113, %200 : vector<8x128xf32>
    %202 = arith.mulf %195, %201 : vector<8x128xf32>
    %203 = arith.addf %113, %1 : vector<8x128xf32>
    %cst_65 = arith.constant 1.000000e+00 : f32
    %204 = vector.broadcast %cst_65 : f32 to vector<8x128xf32>
    %205 = arith.addf %203, %204 : vector<8x128xf32>
    %206 = arith.mulf %199, %205 : vector<8x128xf32>
    %cst_66 = arith.constant 2.000000e+00 : f32
    %207 = vector.broadcast %cst_66 : f32 to vector<8x128xf32>
    %208 = arith.addf %113, %207 : vector<8x128xf32>
    %209 = arith.mulf %202, %208 : vector<8x128xf32>
    %210 = arith.addf %113, %1 : vector<8x128xf32>
    %cst_67 = arith.constant 2.000000e+00 : f32
    %211 = vector.broadcast %cst_67 : f32 to vector<8x128xf32>
    %212 = arith.addf %210, %211 : vector<8x128xf32>
    %213 = arith.mulf %206, %212 : vector<8x128xf32>
    %cst_68 = arith.constant 3.000000e+00 : f32
    %214 = vector.broadcast %cst_68 : f32 to vector<8x128xf32>
    %215 = arith.addf %113, %214 : vector<8x128xf32>
    %216 = arith.mulf %209, %215 : vector<8x128xf32>
    %217 = arith.addf %113, %1 : vector<8x128xf32>
    %cst_69 = arith.constant 3.000000e+00 : f32
    %218 = vector.broadcast %cst_69 : f32 to vector<8x128xf32>
    %219 = arith.addf %217, %218 : vector<8x128xf32>
    %220 = arith.mulf %213, %219 : vector<8x128xf32>
    %221 = tpu.reciprocal %220 {approx = true} : vector<8x128xf32> -> vector<8x128xf32>
    %222 = arith.mulf %220, %221 : vector<8x128xf32>
    %cst_70 = arith.constant 2.000000e+00 : f32
    %223 = vector.broadcast %cst_70 : f32 to vector<8x128xf32>
    %224 = arith.subf %223, %222 : vector<8x128xf32>
    %225 = arith.mulf %221, %224 : vector<8x128xf32>
    %226 = arith.mulf %216, %225 : vector<8x128xf32>
    %227 = arith.mulf %226, %6 : vector<8x128xf32>
    %228 = arith.mulf %227, %190 : vector<8x128xf32>
    %229 = arith.addf %108, %228 : vector<8x128xf32>
    %c0_71 = arith.constant 0 : index
    %c0_72 = arith.constant 0 : index
    %230 = vector.load %arg4[%c0_71, %c0_72] : memref<8x128xf32, #tpu.memory_space<vmem>>, vector<8x128xf32>
    tpu.vector_store %arg4[%c0_71, %c0_72], %229 {strides = array<i32>} : memref<8x128xf32, #tpu.memory_space<vmem>>, vector<8x128xf32>,
    return
  }
  func.func @transform_0(%arg0: i32) -> (i32, i32) {
    %c0_i32 = arith.constant 0 : i32
    %c0_i32_0 = arith.constant 0 : i32
    return %arg0, %c0_i32 : i32, i32
  }
  func.func @transform_1(%arg0: i32) -> (i32, i32) {
    %c0_i32 = arith.constant 0 : i32
    %c0_i32_0 = arith.constant 0 : i32
    return %arg0, %c0_i32 : i32, i32
  }
  func.func @transform_2(%arg0: i32) -> (i32, i32) {
    %c0_i32 = arith.constant 0 : i32
    %c0_i32_0 = arith.constant 0 : i32
    return %arg0, %c0_i32 : i32, i32
  }
  func.func @transform_3(%arg0: i32) -> (i32, i32) {
    %c0_i32 = arith.constant 0 : i32
    %c0_i32_0 = arith.constant 0 : i32
    return %arg0, %c0_i32 : i32, i32
  }
}

</mosaic_0001>

<bundles_post_ra>
// kernel: _asym_beta_loss_call.1
= control target key start
LH: loop header
LB: loop body
LE: loop exit
PB: predicated region body
PF: predicated region fallthrough
CT: control target
= control target key end

     0   :  { %s1072_s0 = inlined_call_operand.hbm [shape: f32[16,128], index: 0, kind: input, shape index: {}]   ;;  %s1073_s1 = inlined_call_operand.hbm [shape: f32[16,128], index: 1, kind: input, shape index: {}]   ;;  %s1074_s2 = inlined_call_operand.hbm [shape: f32[16,128], index: 2, kind: input, shape index: {}]   ;;  %s1075_s3 = inlined_call_operand.hbm [shape: f32[16,128], index: 3, kind: output, shape index: {}]  }
   0x1   :  { %1079 = sst [smem:[#allocation13_spill]] %s1072_s0 }
   0x2   :  { %1080 = sst [smem:[#allocation14_spill]] %s1073_s1 }
   0x3   :  { %8 = vsyncpa [#allocation3], 0 }
   0x4   :  { %10 = vsyncpa [#allocation3 + $0x1], 0 }
   0x5   :  { %11 = vsyncpa [#allocation6], 0 }
   0x6   :  { %13 = vsyncpa [#allocation6 + $0x1], 0 }
   0x7   :  { %14 = vsyncpa [#allocation4], 0 }
   0x8   :  { %16 = vsyncpa [#allocation4 + $0x1], 0  ;;  %s815_s12 = smov 0   ;;  %s817_s13 = smov 0  }
   0x9   :  { %s819_s14 = smov 0   ;;  %s821_s15 = smov 0  }
   0xa LB: > { %s836_s16 = sadd.s32 4294967295, %s789_s15   ;;  %s543_s17 = sadd.s32 4294967294, %s789_s15   ;;  %s789_s15 = sphi %s821_s15, %s1101_s15   ;;  %s785_s14 = sphi %s819_s14, %s1100_s14   ;;  %s781_s13 = sphi %s817_s13, %s1099_s13   ;;  %s777_s12 = sphi %s815_s12, %s1098_s12  }
   0xb   : > { %s840_s18 = sadd.s32 1, %s789_s15   ;;  %s29_s19 = sadd.s32 1, %s785_s14 }
   0xc   : > { %s26_s20 = ssub.s32 %s789_s15, %s840_s18  ;;  %p36_p0 = scmp.ne.s32.totalorder %s785_s14, %s781_s13 }
   0xd   : > { %p27_p1 = scmp.eq.s32.totalorder %s26_s20, 0  ;;  %p37_p2 = scmp.eq.s32.totalorder %s789_s15, 0 }
   0xe   : > { %p42_p3 = scmp.ne.s32.totalorder %s781_s13, %s777_s12  ;;  %p43_p4 = scmp.eq.s32.totalorder %s836_s16, 0 }
   0xf   : > { %s852_s21 = scalar_select %p27_p1, %s785_s14, %s29_s19  }
  0x10   : > { %p38_p5 = por %p37_p2, %p36_p0  ;;  %p854_p6 = por %p43_p4, %p42_p3 }
  0x11   : > { %1081 = sst [smem:[#allocation12_spill]] %s852_s21  ;;  %p118_p7 = scmp.eq.s32.totalorder %s836_s16, 1 }
  0x12   : > { %s1082_s22 = scalar_select %p854_p6, 1, 0 }
  0x13   : > { %p124_p8 = scmp.eq.s32.totalorder %s543_s17, 1  ;;  %p583_p10 = scmp.lt.s32.totalorder %s789_s15, 2 }
  0x14   : > { %p861_p11 = por %p118_p7, %p36_p0  ;;  %s1076_s25 = sand.u32 1, %s785_s14  }
  0x15   : > { %p865_p12 = por %p124_p8, %p42_p3  ;;  %s871_s26 = sshll.u32 %s789_s15, 7 }
  0x16   : > { %s1083_s23 = scalar_select %p861_p11, 1, 0 }
  0x17   : > { %s1084_s24 = scalar_select %p865_p12, 1, 0 }
  0x18   : > { %s875_s27 = sshll.u32 %s1076_s25, 3  ;;  %p877_p13 = pnand %p583_p10, %p38_p5 }
  0x19   : > { %s162_s29 = sand.u32 1, %s789_s15   ;;  %s1086_s1 = sld [smem:[#allocation14_spill]] }
  0x1a   : > { %s166_s6 = scalar_lea.vmem [#allocation5], %s875_s27  ;;  %s890_s8 = scalar_lea.sflag [#allocation6], %s162_s29 }
  0x1b   : > { %s173_s7 = sshll.u32 %s166_s6, 4  ;;  %p896_p2 = pneg %p877_p13  ;;  %s174_s7 = int_to_ptr.vmem [resolvable:$true] %s173_s7 }
  0x1f   : > { %s886_s5 = scalar_lea.hbm %s1086_s1, %s871_s26  ;;  %s642_s19 = scalar_lea.hbm %s1086_s1, 256 }
  0x20   : > { %s637_s9 = scalar_lea.hbm %s886_s5, 128  ;;  %p643_p5 = scmp.lt.s32.totalorder %s886_s5, %s1086_s1 }
  0x21   : > { %p638_p1 = scmp.ne.s32.totalorder %s886_s5, %s637_s9  ;;  %p644_p7 = scmp.lt.s32.totalorder %s642_s19, %s637_s9 }
  0x23   : > { %p640_p3 = pnand %p896_p2, %p638_p1  ;;  %p645_p8 = por %p644_p7, %p643_p5 }
  0x25   : > { %p641_p4 = pneg %p640_p3 }
  0x27   : > { %p646_p10 = pnand %p645_p8, %p641_p4 }
  0x29   : > { %649 = shalt.err (!%p646_p10)
}
  0x2a   : > { %s650_s29 = scalar_lea.vmem %s174_s7, 128  ;;  %s791_s4 = smov [#allocation5]  }
  0x2b   : > { %p651_p9 = scmp.ne.s32.totalorder %s174_s7, %s650_s29  ;;  %s655_s6 = sshll.u32 %s791_s4, 4  ;;  %s656_s6 = int_to_ptr.vmem [resolvable:$false] %s655_s6 }
  0x2c   : > { %s657_s25 = scalar_lea.vmem %s656_s6, 256  ;;  %p658_p1 = scmp.lt.s32.totalorder %s174_s7, %s656_s6 }
  0x2d   : > { %p653_p0 = pnand %p651_p9, %p896_p2  ;;  %p659_p3 = scmp.lt.s32.totalorder %s657_s25, %s650_s29 }
  0x2f   : > { %p654_p12 = pneg %p653_p0  ;;  %p660_p11 = por %p659_p3, %p658_p1 }
  0x31   : > { %p661_p6 = pnand %p660_p11, %p654_p12 }
  0x33   : > { %664 = shalt.err (!%p661_p6)
}
  0x34   : > { %575 = dma.hbm_to_vmem [thread:$0]  (!%p877_p13), %s886_s5, 128, %s174_s7, %s890_s8  }
  0x35   : > { %p196_p9 = scmp.lt.s32.totalorder %s789_s15, 3  ;;  %s1088_s0 = sld [smem:[#allocation13_spill]] }
  0x36   : > { %p1089_p0 = scmp.ge.s32.totalorder %s789_s15, 1  ;;  %s148_s19 = scalar_lea.vmem [#allocation2], %s875_s27 }
  0x37   : > { %s155_s20 = sshll.u32 %s148_s19, 4  ;;  %s1091_s30 = sand.u32 1, %s785_s14   ;;  %s156_s20 = int_to_ptr.vmem [resolvable:$true] %s155_s20 }
  0x38   : > { %p924_p6 = pnand %p1089_p0, %p196_p9  ;;  %s145_s29 = scalar_lea.sflag [#allocation3], %s1091_s30 }
  0x3a   : > { %s1090_s25 = scalar_select %p924_p6, 1, 0 }
  0x3b   : > { %s920_s17 = scalar_lea.hbm %s1088_s0, %s871_s26  ;;  %s670_s6 = scalar_lea.hbm %s1088_s0, 256 }
  0x3c   : > { %s665_s5 = scalar_lea.hbm %s920_s17, 128  ;;  %p671_p5 = scmp.lt.s32.totalorder %s920_s17, %s1088_s0 }
  0x3d   : > { %p666_p11 = scmp.ne.s32.totalorder %s920_s17, %s665_s5  ;;  %p672_p7 = scmp.lt.s32.totalorder %s670_s6, %s665_s5 }
  0x3f   : > { %p668_p12 = pnand %p666_p11, %p896_p2  ;;  %p673_p8 = por %p672_p7, %p671_p5 }
  0x41   : > { %p669_p4 = pneg %p668_p12 }
  0x43   : > { %p674_p10 = pnand %p673_p8, %p669_p4 }
  0x45   : > { %677 = shalt.err (!%p674_p10)
}
  0x46   : > { %s678_s19 = scalar_lea.vmem %s156_s20, 128  ;;  %s792_s30 = smov [#allocation2]  }
  0x47   : > { %p679_p1 = scmp.ne.s32.totalorder %s156_s20, %s678_s19  ;;  %s683_s1 = sshll.u32 %s792_s30, 4  ;;  %s684_s1 = int_to_ptr.vmem [resolvable:$false] %s683_s1 }
  0x48   : > { %s685_s21 = scalar_lea.vmem %s684_s1, 256  ;;  %p686_p0 = scmp.lt.s32.totalorder %s156_s20, %s684_s1 }
  0x49   : > { %p681_p3 = pnand %p679_p1, %p896_p2  ;;  %p687_p11 = scmp.lt.s32.totalorder %s685_s21, %s678_s19 }
  0x4b   : > { %p682_p9 = pneg %p681_p3  ;;  %p688_p12 = por %p687_p11, %p686_p0 }
  0x4d   : > { %p689_p6 = pnand %p688_p12, %p682_p9 }
  0x4f   : > { %692 = shalt.err (!%p689_p6)
}
  0x50   : > { %572 = dma.hbm_to_vmem [thread:$0]  (!%p877_p13), %s920_s17, 128, %s156_s20, %s145_s29  }
  0x51   : > { %s189_s4 = scalar_lea.hbm %s1074_s2, %s871_s26  ;;  %s184_s6 = scalar_lea.vmem [#allocation7], %s875_s27 }
  0x52   : > { %s191_s9 = sshll.u32 %s184_s6, 4  ;;  %s693_s11 = scalar_lea.hbm %s189_s4, 128  ;;  %s192_s9 = int_to_ptr.vmem [resolvable:$true] %s191_s9 }
  0x53   : > { %p694_p4 = scmp.ne.s32.totalorder %s189_s4, %s693_s11  ;;  %s698_s19 = scalar_lea.hbm %s1074_s2, 256 }
  0x54   : > { %p699_p6 = scmp.lt.s32.totalorder %s189_s4, %s1074_s2  ;;  %p700_p8 = scmp.lt.s32.totalorder %s698_s19, %s693_s11 }
  0x55   : > { %p696_p5 = pnand %p694_p4, %p896_p2 }
  0x56   : > { %p701_p10 = por %p700_p8, %p699_p6 }
  0x57   : > { %p697_p7 = pneg %p696_p5 }
  0x59   : > { %p702_p1 = pnand %p701_p10, %p697_p7 }
  0x5b   : > { %705 = shalt.err (!%p702_p1)
}
  0x5c   : > { %s706_s26 = scalar_lea.vmem %s192_s9, 128  ;;  %s793_s27 = smov [#allocation7]  }
  0x5d   : > { %p707_p3 = scmp.ne.s32.totalorder %s192_s9, %s706_s26  ;;  %s711_s17 = sshll.u32 %s793_s27, 4  ;;  %s712_s17 = int_to_ptr.vmem [resolvable:$false] %s711_s17 }
  0x5e   : > { %s713_s20 = scalar_lea.vmem %s712_s17, 256  ;;  %p714_p11 = scmp.lt.s32.totalorder %s192_s9, %s712_s17 }
  0x5f   : > { %p709_p9 = pnand %p707_p3, %p896_p2  ;;  %p715_p12 = scmp.lt.s32.totalorder %s713_s20, %s706_s26 }
  0x61   : > { %p710_p0 = pneg %p709_p9  ;;  %p716_p4 = por %p715_p12, %p714_p11 }
  0x63   : > { %p717_p5 = pnand %p716_p4, %p710_p0 }
  0x65   : > { %720 = shalt.err (!%p717_p5)
}
  0x66   : > { %578 = dma.hbm_to_vmem [thread:$0]  (!%p877_p13), %s189_s4, 128, %s192_s9, %s890_s8  }
  0x67   : > { %p1092_p7 = scmp.ne.s32.totalorder %s1090_s25, 0 }
  0x68   : > { %s968_s0 = sand.u32 (!%p1092_p7), 1, %s781_s13   ;;  %p1093_p2 = scmp.ne.s32.totalorder (!%p1092_p7), %s1082_s22, 0 }
  0x69   : > { %200 = sbr.rel (%p1092_p7) target bundleno = 185 (0xb9), region = 32  ;;  %s971_s10 = sshll.u32 (!%p1092_p7), %s968_s0, 3 }
  0x6a   : > { %s203_s29 = scalar_lea.sflag (!%p1092_p7), [#allocation3], %s968_s0  ;;  %s206_s5 = scalar_lea.vmem (!%p1092_p7), [#allocation2], %s971_s10 }
  0x6e   : > { %764 = dma.done.wait (%p1093_p2), %s203_s29, 128  }
  0x6f   : > { %766 = vsyncadd (%p1093_p2), %s203_s29, 4294967168  ;;  %s211_s28 = sand.u32 1, %s836_s16   ;;  %s215_s25 = scalar_lea.vmem [#allocation5], %s971_s10 }
  0x70   : > { %s212_s8 = scalar_lea.sflag [#allocation6], %s211_s28 }
  0x71   : > { %768 = dma.done.wait (%p1093_p2), %s212_s8, 256  }
  0x72   : > { %770 = vsyncadd (%p1093_p2), %s212_s8, 4294967040  ;;  %v985_v0 = vld [vmem:[%s215_s25] sm:$0xff]  ;;  %v987_v1 = vld [vmem:[%s206_s5] sm:$0xff]  ;;  %s224_s22 = scalar_lea.vmem [#allocation7], %s971_s10  ;;  %s256_s7 = scalar_lea.vmem [#allocation8], %s971_s10 }
  0x73   : > { %v991_v2 = vadd.f32 %v985_v0, %v987_v1  ;;  %v303_v3 = vadd.f32 1.0, %v987_v1  ;;  %v305_v4 = vadd.f32 2.0, %v987_v1  ;;  %v306_v5 = vadd.f32 3.0, %v987_v1  ;;  %s430_s4 = sshll.u32 %s256_s7, 4  ;;  %s558_s6 = sshll.u32 %s836_s16, 7  ;;  %s431_s4 = int_to_ptr.vmem [resolvable:$true] %s430_s4 }
  0x74   : > { %v314_v6 = vadd.f32 4.0, %v987_v1  ;;  %v336_v15 = vmul.f32 0.25, %v985_v0  ;;  %v361_v17 = vadd.f32 1.0, %v985_v0  ;;  %v363_v20 = vadd.f32 2.0, %v985_v0  ;;  %s428_s1 = scalar_lea.hbm %s1075_s3, %s558_s6  ;;  %s417_s21 = scalar_lea.sflag [#allocation4], %s968_s0 }
  0x75   : > { %v270_v7 = vadd.f32 1.0, %v991_v2  ;;  %v272_v8 = vadd.f32 2.0, %v991_v2  ;;  %v273_v9 = vadd.f32 3.0, %v991_v2  ;;  %v281_v10 = vadd.f32 4.0, %v991_v2  ;;  %s721_s19 = scalar_lea.vmem %s431_s4, 128  ;;  %p1094_p6 = scmp.ne.s32.totalorder %s1083_s23, 0 }
  0x76   : > { %v304_v11 = vmul.f32 %v303_v3, %v987_v1  ;;  %v307_v13 = vmul.f32 %v306_v5, %v305_v4  ;;  %617 = vrcp.f32 %v314_v6  ;;  %v337_v19 = vsub.f32 %v987_v1, %v336_v15  ;;  %p722_p13 = scmp.ne.s32.totalorder %s431_s4, %s721_s19  ;;  %s794_s30 = smov [#allocation8]  }
  0x77   : > { %v271_v12 = vmul.f32 %v270_v7, %v991_v2  ;;  %v274_v14 = vmul.f32 %v273_v9, %v272_v8  ;;  %619 = vrcp.f32 %v281_v10  ;;  %v297_v21 = vmul.f32 4.0, %v987_v1  ;;  %s725_s26 = sshll.u32 %s794_s30, 4  ;;  %s726_s26 = int_to_ptr.vmem [resolvable:$false] %s725_s26 }
  0x78   : > { %v308_v16 = vmul.f32 %v307_v13, %v304_v11  ;;  %v1008_v22 = vmax.f32 %v337_v19, 0.0  ;;  %v364_v23 = vadd.f32 3.0, %v985_v0  ;;  %v362_v24 = vmul.f32 %v361_v17, %v985_v0  ;;  %p723_p8 = pnand %p722_p13, %p1094_p6  ;;  %s727_s27 = scalar_lea.vmem %s726_s26, 256 }
  0x79   : > { %v275_v18 = vmul.f32 %v274_v14, %v271_v12  ;;  %v372_v25 = vadd.f32 4.0, %v985_v0  ;;  %v264_v28 = vmul.f32 4.0, %v991_v2  ;;  %v298_v29 = vadd.f32 18.0, %v297_v21  ;;  %p728_p1 = scmp.lt.s32.totalorder %s431_s4, %s726_s26  ;;  %p729_p3 = scmp.lt.s32.totalorder %s727_s27, %s721_s19 }
  0x7a   : > { %621 = vrcp.f32 %v308_v16  ;;  %v339_v26 = vadd.f32 %v1008_v22, %v985_v0  ;;  %v365_v27 = vmul.f32 %v364_v23, %v363_v20  ;;  %v355_v46 = vmul.f32 4.0, %v985_v0  ;;  %p724_p10 = pneg %p723_p8 }
  0x7b   : > { %623 = vrcp.f32 %v275_v18  ;;  %v265_v36 = vadd.f32 18.0, %v264_v28  ;;  %v299_v38 = vmul.f32 %v298_v29, %v987_v1  ;;  %p730_p9 = por %p729_p3, %p728_p1 }
  0x7c   : > { %625 = vrcp.f32 %v372_v25  ;;  %v340_v30 = vadd.f32 4.0, %v339_v26  ;;  %v397_v31 = vadd.f32 1.0, %v339_v26  ;;  %v1016_v32 = vmul.f32 %v365_v27, %v362_v24 }
  0x7d   : > { %v401_v33 = vadd.f32 2.0, %v339_v26  ;;  %v405_v35 = vadd.f32 3.0, %v339_v26  ;;  %v266_v44 = vmul.f32 %v265_v36, %v991_v2  ;;  %v300_v48 = vadd.f32 22.0, %v299_v38  ;;  %p731_p0 = pnand %p730_p9, %p724_p10 }
  0x7e   : > { %627 = vrcp.f32 %v340_v30  ;;  %v398_v34 = vmul.f32 %v397_v31, %v339_v26  ;;  %v356_v55 = vadd.f32 18.0, %v355_v46  ;;  %v399_v26 = vadd.f32 2.0, %v1008_v22 }
  0x7f   : > { %629 = vrcp.f32 %v1016_v32  ;;  %v267_v53 = vadd.f32 22.0, %v266_v44  ;;  %v301_v58 = vmul.f32 %v300_v48, %v987_v1  ;;  %v395_v1 = vadd.f32 1.0, %v1008_v22 }
  0x80   : > { %v402_v39 = vmul.f32 %v401_v33, %v398_v34  ;;  %v357_v7 = vmul.f32 %v356_v55, %v985_v0 }
  0x81   : > { %v268_v5 = vmul.f32 %v267_v53, %v991_v2  ;;  %v302_v11 = vadd.f32 6.0, %v301_v58 }
  0x82   : > { %v1020_v43 = vmul.f32 %v405_v35, %v402_v39  ;;  %v358_v2 = vadd.f32 22.0, %v357_v7 }
  0x83   : > { %v618_v37 = vpop.eup %617  ;;  %v269_v19 = vadd.f32 6.0, %v268_v5 }
  0x84   : > { %v620_v40 = vpop.eup %619  ;;  %v316_v41 = vmul.f32 %v618_v37, %v314_v6  ;;  %631 = vrcp.f32 %v1020_v43  ;;  %v359_v46 = vmul.f32 %v358_v2, %v985_v0 }
  0x85   : > { %v283_v42 = vmul.f32 %v620_v40, %v281_v10 }
  0x86   : > { %v317_v45 = vsub.f32 2.0, %v316_v41 }
  0x87   : > { %v284_v47 = vsub.f32 2.0, %v283_v42  ;;  %v622_v50 = vpop.eup %621 }
  0x88   : > { %v318_v49 = vmul.f32 %v618_v37, %v317_v45  ;;  %v624_v52 = vpop.eup %623  ;;  %v310_v59 = vmul.f32 %v622_v50, %v308_v16 }
  0x89   : > { %v285_v51 = vmul.f32 %v620_v40, %v284_v47  ;;  %v626_v56 = vpop.eup %625  ;;  %v277_v62 = vmul.f32 %v624_v52, %v275_v18  ;;  %v396_v40 = vmul.f32 %v395_v1, %v1008_v22 }
  0x8a   : > { %v319_v54 = vmul.f32 %v318_v49, %v318_v49  ;;  %v374_v61 = vmul.f32 %v626_v56, %v372_v25  ;;  %v330_v3 = vmul.f32 %v318_v49, %v281_v10  ;;  %v311_v13 = vsub.f32 2.0, %v310_v59 }
  0x8b   : > { %v286_v57 = vmul.f32 %v285_v51, %v285_v51  ;;  %v628_v4 = vpop.eup %627  ;;  %v278_v17 = vsub.f32 2.0, %v277_v62  ;;  %v320_v37 = vmul.f32 -0.5, %v318_v49  ;;  %v287_v41 = vmul.f32 -0.5, %v285_v51 }
  0x8c   : > { %v321_v60 = vmul.f32 0.004166667, %v319_v54  ;;  %v375_v8 = vsub.f32 2.0, %v374_v61  ;;  %v342_v12 = vmul.f32 %v628_v4, %v340_v30  ;;  %v630_v16 = vpop.eup %629  ;;  %633 = vlog2.f32 %v330_v3 }
  0x8d   : > { %v288_v63 = vmul.f32 0.004166667, %v286_v57  ;;  %v312_v28 = vmul.f32 %v622_v50, %v311_v13  ;;  %v368_v31 = vmul.f32 %v630_v16, %v1016_v32  ;;  %v279_v34 = vmul.f32 %v624_v52, %v278_v17 }
  0x8e   : > { %v322_v6 = vsub.f32 0.003968254, %v321_v60  ;;  %v376_v15 = vmul.f32 %v626_v56, %v375_v8  ;;  %v343_v10 = vsub.f32 2.0, %v342_v12  ;;  %v403_v56 = vadd.f32 3.0, %v1008_v22 }
  0x8f   : > { %v289_v9 = vsub.f32 0.003968254, %v288_v63  ;;  %v369_v32 = vsub.f32 2.0, %v368_v31  ;;  %v280_v48 = vmul.f32 %v279_v34, %v269_v19  ;;  %v313_v52 = vmul.f32 %v312_v28, %v302_v11 }
  0x90   : > { %v323_v14 = vmul.f32 %v322_v6, %v319_v54  ;;  %v377_v21 = vmul.f32 %v376_v15, %v376_v15  ;;  %v344_v24 = vmul.f32 %v628_v4, %v343_v10  ;;  %v388_v25 = vmul.f32 %v376_v15, %v340_v30 }
  0x91   : > { %v290_v18 = vmul.f32 %v289_v9, %v286_v57  ;;  %v632_v27 = vpop.eup %631  ;;  %v400_v59 = vmul.f32 %v399_v26, %v396_v40  ;;  %v360_v61 = vadd.f32 6.0, %v359_v46 }
  0x92   : > { %v324_v20 = vsub.f32 0.008333334, %v323_v14  ;;  %v379_v33 = vmul.f32 0.004166667, %v377_v21  ;;  %v345_v36 = vmul.f32 %v344_v24, %v344_v24  ;;  %635 = vlog2.f32 %v388_v25 }
  0x93   : > { %v291_v23 = vsub.f32 0.008333334, %v290_v18  ;;  %v408_v44 = vmul.f32 %v632_v27, %v1020_v43  ;;  %v259_v43 = vld [vmem:[%s224_s22] sm:$0xff]  ;;  %v404_v8 = vmul.f32 %v403_v56, %v400_v59  ;;  %v346_v14 = vmul.f32 -0.5, %v344_v24 }
  0x94   : > { %v325_v29 = vmul.f32 %v324_v20, %v319_v54  ;;  %v380_v39 = vsub.f32 0.003968254, %v379_v33  ;;  %v347_v30 = vmul.f32 0.004166667, %v345_v36  ;;  %v260_v6 = vsub.f32 1.0, %v259_v43 }
  0x95   : > { %v292_v35 = vmul.f32 %v291_v23, %v286_v57  ;;  %v409_v60 = vsub.f32 2.0, %v408_v44 }
  0x96   : > { %v326_v38 = vsub.f32 0.083333336, %v325_v29  ;;  %v381_v47 = vmul.f32 %v380_v39, %v377_v21  ;;  %v348_v53 = vsub.f32 0.003968254, %v347_v30  ;;  %v262_v18 = vmul.f32 %v260_v6, %v260_v6 }
  0x97   : > { %v293_v42 = vsub.f32 0.083333336, %v292_v35  ;;  %v410_v9 = vmul.f32 %v632_v27, %v409_v60 }
  0x98   : > { %v327_v45 = vmul.f32 %v326_v38, %v319_v54  ;;  %v382_v55 = vsub.f32 0.008333334, %v381_v47  ;;  %v349_v51 = vmul.f32 %v348_v53, %v345_v36  ;;  %v370_v54 = vmul.f32 %v630_v16, %v369_v32 }
  0x99   : > { %v294_v50 = vmul.f32 %v293_v42, %v286_v57  ;;  %v634_v4 = vpop.eup %633  ;;  %v378_v57 = vmul.f32 -0.5, %v376_v15  ;;  %v411_v19 = vmul.f32 %v410_v9, %v404_v8  ;;  %v261_v15 = vmul.f32 %v259_v43, %v259_v43 }
  0x9a   : > { %v328_v49 = vsub.f32 %v320_v37, %v327_v45  ;;  %v383_v62 = vmul.f32 %v382_v55, %v377_v21  ;;  %v350_v3 = vsub.f32 0.008333334, %v349_v51  ;;  %v371_v22 = vmul.f32 %v370_v54, %v360_v61 }
  0x9b   : > { %v295_v58 = vsub.f32 %v287_v41, %v294_v50  ;;  %v332_v12 = vmul.f32 0.6931472, %v634_v4 }
  0x9c   : > { %v329_v63 = vsub.f32 %v328_v49, %v313_v52  ;;  %v384_v5 = vsub.f32 0.083333336, %v383_v62  ;;  %v351_v7 = vmul.f32 %v350_v3, %v345_v36 }
  0x9d   : > { %v296_v0 = vsub.f32 %v295_v58, %v280_v48 }
  0x9e   : > { %v385_v11 = vmul.f32 %v384_v5, %v377_v21  ;;  %v352_v1 = vsub.f32 0.083333336, %v351_v7  ;;  %v412_v21 = vmul.f32 %v411_v19, %v262_v18 }
  0x9f   : > { %v333_v13 = vsub.f32 %v296_v0, %v329_v63  ;;  %v636_v17 = vpop.eup %635 }
  0xa0   : > { %v386_v16 = vsub.f32 %v378_v57, %v385_v11  ;;  %v353_v10 = vmul.f32 %v352_v1, %v345_v36  ;;  %v390_v25 = vmul.f32 0.6931472, %v636_v17 }
  0xa1   : > { %v334_v2 = vadd.f32 %v333_v13, %v332_v12 }
  0xa2   : > { %v387_v20 = vsub.f32 %v386_v16, %v371_v22  ;;  %v354_v23 = vsub.f32 %v346_v14, %v353_v10 }
  0xa3   : > { %v335_v27 = vmul.f32 %v334_v2, %v261_v15 }
  0xa4   : > { %v391_v26 = vsub.f32 %v354_v23, %v387_v20 }
  0xa6   : > { %v392_v28 = vadd.f32 %v391_v26, %v390_v25 }
  0xa8   : > { %v413_v24 = vmul.f32 %v412_v21, %v392_v28 }
  0xaa   : > { %v414_v29 = vadd.f32 %v413_v24, %v335_v27 }
  0xac   : > { %415 = vst [vmem:[%s256_s7] sm:$0xff] %v414_v29 }
  0xad   : > { %734 = shalt.err (!%p731_p0)
}
  0xae   : > { %s735_s16 = scalar_lea.hbm %s428_s1, 128  ;;  %s739_s0 = scalar_lea.hbm %s1075_s3, 256 }
  0xaf   : > { %p736_p11 = scmp.ne.s32.totalorder %s428_s1, %s735_s16  ;;  %p740_p5 = scmp.lt.s32.totalorder %s428_s1, %s1075_s3 }
  0xb0   : > { %p741_p7 = scmp.lt.s32.totalorder %s739_s0, %s735_s16 }
  0xb1   : > { %p737_p12 = pnand %p736_p11, %p1094_p6 }
  0xb2   : > { %p742_p2 = por %p741_p7, %p740_p5 }
  0xb3   : > { %p738_p4 = pneg %p737_p12 }
  0xb5   : > { %p743_p13 = pnand %p742_p2, %p738_p4 }
  0xb7   : > { %746 = shalt.err (!%p743_p13)
}
  0xb8   : > { %567 = dma.vmem_to_hbm [thread:$0]  (%p1094_p6), %s431_s4, 128, %s428_s1, %s417_s21  }
  0xb9 PF: > { %s442_s5 = sand.u32 1, %s777_s12   ;;  %p1095_p8 = scmp.ne.s32.totalorder %s1084_s24, 0 }
  0xba   : > { %p1096_p10 = scmp.ge.s32.totalorder %s789_s15, 2  ;;  %s443_s28 = scalar_lea.sflag [#allocation4], %s442_s5 }
  0xbc   : > { %p580_p1 = pnand %p1096_p10, %p1095_p8 }
  0xbe   : > { %p581_p3 = pneg %p580_p1 }
  0xc0   : > { %772 = dma.done.wait (%p581_p3), %s443_s28, 128  }
  0xc1   : > { %774 = vsyncadd (%p581_p3), %s443_s28, 4294967168  ;;  %s1097_s8 = sld [smem:[#allocation12_spill]]  ;;  %p19_p9 = scmp.ge.s32.totalorder %s840_s18, 4  }
  0xc2   : > { %s1098_s12 = smov %s781_s13  ;;  %s1099_s13 = smov %s785_s14 }
  0xc3   : > { %s1101_s15 = smov %s840_s18  ;;  %21 = sbr.rel (!%p19_p9) target bundleno = 10 (0xa), region = 101 }
  0xc7   : > { %s1100_s14 = smov %s1097_s8 }
  0xc8   :  { %448 = vsyncpa [#allocation3], 1 }
  0xc9   :  { %450 = vsyncpa [#allocation3 + $0x1], 1 }
  0xca   :  { %451 = vsyncpa [#allocation6], 1 }
  0xcb   :  { %453 = vsyncpa [#allocation6 + $0x1], 1 }
  0xcc   :  { %454 = vsyncpa [#allocation4], 1 }
  0xcd   :  { %456 = vsyncpa [#allocation4 + $0x1], 1 }

</bundles_post_ra>
